<compile_context>
chip_gen: v5e
topology: v5e:2x2
jax: 0.10.0
libtpu: 0.0.40
codegen_flags: <defaults>
</compile_context>

<pallas_src>
from functools import partial

import jax
import jax.numpy as jnp
from jax import lax
from jax.experimental import pallas as pl
from jax.experimental.pallas import tpu as pltpu


def _dot(a, b, dims=(((1,), (0,)), ((), ())), compute_dtype=None):
    """MXU matmul with optional bf16 operands and f32 accumulation."""
    if compute_dtype is not None:
        a = a.astype(compute_dtype)
        b = b.astype(compute_dtype)
    return lax.dot_general(a, b, dims, preferred_element_type=jnp.float32)


def kv_proj_kernel(k_ref, v_ref, wk_ref, bk_ref, wv_ref, bv_ref,
                   kh_ref, vh_ref, *, compute_dtype):
    """One-shot K/V projection: (TK, Dk) @ (Dk, hid) + bias, done once per batch."""
    dot = partial(_dot, compute_dtype=compute_dtype)
    kh_ref[0] = (dot(k_ref[0], wk_ref[...]) + bk_ref[...]).astype(kh_ref.dtype)
    vh_ref[0] = (dot(v_ref[0], wv_ref[...]) + bv_ref[...]).astype(vh_ref.dtype)


def mha_attn_kernel(q_ref, kh_ref, vh_ref, qm_ref, kbias_ref,
                    wq_ref, bq_ref, wo_ref, bo_ref,
                    out_ref,
                    qh_scr, acc_scr, m_scr, l_scr,
                    *, head_num, head_dims, causality, compute_dtype):
    i = pl.program_id(1)                 # query-tile index
    j = pl.program_id(2)                 # key-tile index (innermost, "arbitrary")
    nk = pl.num_programs(2)
    H, Dh = head_num, head_dims
    tq = q_ref.shape[1]
    tk = kh_ref.shape[1]
    dot = partial(_dot, compute_dtype=compute_dtype)
    approx = compute_dtype is not None   # EUP approx reciprocal only on the fast path

    # --- once per query tile: fused, pre-scaled Q projection + flash-state init ---
    @pl.when(j == 0)
    def _():
        scale = float(head_dims) ** (-0.5)
        qh_scr[...] = (dot(q_ref[0], wq_ref[...]) + bq_ref[...]) * scale  # (TQ, hid)
        acc_scr[...] = jnp.zeros_like(acc_scr)
        m_scr[...] = jnp.full_like(m_scr, -1e30)
        l_scr[...] = jnp.zeros_like(l_scr)

    # --- head-independent additive bias for this (query-tile, key-tile) pair ---
    bias = kbias_ref[0]                  # (1, TK): 0 or -1e30 (key padding)
    if causality:
        row = lax.broadcasted_iota(jnp.int32, (tq, tk), 0) + i * tq
        col = lax.broadcasted_iota(jnp.int32, (tq, tk), 1) + j * tk
        bias = bias + jnp.where(col > row, -1e30, 0.0)

    qh = qh_scr[...]                     # (TQ, hid), f32
    kh = kh_ref[0]                       # (TK, hid)
    vh = vh_ref[0]                       # (TK, hid)

    # --- flash update; short unrolled per-head loop (H is small) ---
    for h in range(H):
        sl = slice(h * Dh, (h + 1) * Dh)
        # NT contraction over the head dim (K untransposed, no XLU transpose)
        s = dot(qh[:, sl], kh[:, sl], (((1,), (1,)), ((), ()))) + bias   # (TQ, TK)
        m_prev = m_scr[h]                                                # (TQ, 1)
        m_new = jnp.maximum(m_prev, jnp.max(s, axis=-1, keepdims=True))
        alpha = jnp.exp(m_prev - m_new)
        p = jnp.exp(s - m_new)
        l_scr[h] = alpha * l_scr[h] + jnp.sum(p, axis=-1, keepdims=True)
        acc_scr[h] = alpha * acc_scr[h] + dot(p, vh[:, sl])
        m_scr[h] = m_new

    # --- last key tile: normalize, one lane-dense output projection, masks ---
    @pl.when(j == nk - 1)
    def _():
        ctx = jnp.concatenate(
            [acc_scr[h] * pl.reciprocal(l_scr[h], approx=approx) for h in range(H)],
            axis=-1)                                                     # (TQ, hid)
        out = dot(ctx, wo_ref[...]) + bo_ref[...]                        # (TQ, D)
        out_ref[0] = (out * qm_ref[0]).astype(out_ref.dtype)


def mha_forward(query, key, query_mask, key_mask, params, *,
                head_num, head_dims, pad_idx=0, causality=False, value=None,
                block_q=256, block_k=512, matmul_dtype=jnp.bfloat16):
    """Pallas forward matching MultiHeadAttention.forward (drop_rate=0)."""
    if value is None:
        value = key
    B, Lq, D = query.shape
    _, Lk, Dk = key.shape
    H, Dh = head_num, head_dims
    hid = H * Dh

    # --- tiling (the last two block dims must be (8,128)-aligned or full) ---
    tq = min(block_q, Lq)
    if Lq % tq != 0 or tq % 8 != 0:
        tq = Lq          # TODO(synk): pad Lq instead of falling back to a full tile
    nq = Lq // tq
    tk = min(block_k, Lk)
    if Lk % tk != 0 or tk % 128 != 0:
        tk = Lk          # key-pad-bias block's lane dim must be 128-aligned or full
    nk = Lk // tk

    store_dtype = jnp.float32 if matmul_dtype is None else matmul_dtype

    # --- one-shot K/V projection pass (computed once, reused by every query tile) ---
    kh, vh = pl.pallas_call(
        partial(kv_proj_kernel, compute_dtype=matmul_dtype),
        out_shape=(jax.ShapeDtypeStruct((B, Lk, hid), store_dtype),
                   jax.ShapeDtypeStruct((B, Lk, hid), store_dtype)),
        grid=(B, nk),
        in_specs=[
            pl.BlockSpec((1, tk, Dk), lambda b, t: (b, t, 0)),   # key
            pl.BlockSpec((1, tk, Dk), lambda b, t: (b, t, 0)),   # value
            pl.BlockSpec((Dk, hid), lambda b, t: (0, 0)),        # wk
            pl.BlockSpec((1, hid), lambda b, t: (0, 0)),         # bk
            pl.BlockSpec((Dk, hid), lambda b, t: (0, 0)),        # wv
            pl.BlockSpec((1, hid), lambda b, t: (0, 0)),         # bv
        ],
        out_specs=(pl.BlockSpec((1, tk, hid), lambda b, t: (b, t, 0)),
                   pl.BlockSpec((1, tk, hid), lambda b, t: (b, t, 0))),
        compiler_params=pltpu.CompilerParams(
            dimension_semantics=("parallel", "parallel")),
    )(key, value, params["wk"], params["bk"], params["wv"], params["bv"])

    # --- masks hoisted out of the kernel (key padding as one additive bias) ---
    qm = query_mask.reshape(B, Lq, 1).astype(jnp.float32)
    kbias = jnp.where(
        key_mask.reshape(B, 1, Lk).astype(jnp.float32) == float(pad_idx),
        jnp.float32(-1e30), jnp.float32(0.0))

    kern = partial(mha_attn_kernel, head_num=H, head_dims=Dh,
                   causality=causality, compute_dtype=matmul_dtype)

    in_specs = [
        pl.BlockSpec((1, tq, D), lambda b, i, j: (b, i, 0)),     # query
        pl.BlockSpec((1, tk, hid), lambda b, i, j: (b, j, 0)),   # projected K
        pl.BlockSpec((1, tk, hid), lambda b, i, j: (b, j, 0)),   # projected V
        pl.BlockSpec((1, tq, 1), lambda b, i, j: (b, i, 0)),     # query mask
        pl.BlockSpec((1, 1, tk), lambda b, i, j: (b, 0, j)),     # key-pad bias
        pl.BlockSpec((D, hid), lambda b, i, j: (0, 0)),          # wq (full, lane-dense)
        pl.BlockSpec((1, hid), lambda b, i, j: (0, 0)),          # bq
        pl.BlockSpec((hid, D), lambda b, i, j: (0, 0)),          # wo (full, lane-dense)
        pl.BlockSpec((1, D), lambda b, i, j: (0, 0)),            # bo
    ]

    # Rough per-step VMEM working set; only override the scoped limit when needed
    # (v7x: 64 MiB physical / 32 MiB default scoped).
    esz = jnp.dtype(store_dtype).itemsize
    work = (2 * tq * D * 4 + 4 * tk * hid * esz + 2 * tq * 4 + 2 * tk * 4
            + 2 * (D * hid + hid + hid * D + D) * 4 + 2 * tq * D * 4
            + (tq * hid + H * tq * Dh + 2 * H * tq * 128) * 4)
    vmem_limit = int(min(2 * work, 96 << 20)) if work > (24 << 20) else None

    cost = pl.CostEstimate(
        flops=int(2 * B * Lq * D * hid + 4 * B * H * Lq * Lk * Dh
                  + 2 * B * Lq * hid * D),
        transcendentals=int(B * H * Lq * Lk),
        bytes_accessed=int(query.size * 4 + nq * (kh.size + vh.size) * esz
                           + qm.size * 4 + nq * kbias.size * 4 + B * Lq * D * 4
                           + nq * B * (D * hid + 2 * hid + hid * D + D) * 4),
    )

    out = pl.pallas_call(
        kern,
        out_shape=jax.ShapeDtypeStruct((B, Lq, D), jnp.float32),
        grid=(B, nq, nk),
        in_specs=in_specs,
        out_specs=pl.BlockSpec((1, tq, D), lambda b, i, j: (b, i, 0)),
        scratch_shapes=[
            pltpu.VMEM((tq, hid), jnp.float32),    # fused, pre-scaled Q projection
            pltpu.VMEM((H, tq, Dh), jnp.float32),  # per-head running P@V accumulator
            pltpu.VMEM((H, tq, 1), jnp.float32),   # per-head running max
            pltpu.VMEM((H, tq, 1), jnp.float32),   # per-head running denominator
        ],
        compiler_params=pltpu.CompilerParams(
            dimension_semantics=("parallel", "parallel", "arbitrary"),
            vmem_limit_bytes=vmem_limit),
        cost_estimate=cost,
    )(query, kh, vh, qm, kbias,
      params["wq"], params["bq"], params["wo"], params["bo"])
    return out


def ref_forward(query, key, query_mask, key_mask, p, *,
                head_num, head_dims, pad_idx=0, causality=False, value=None):
    """Pure-JAX reference mirroring the PyTorch MultiHeadAttention forward."""
    if value is None:
        value = key
    B, Lq, D = query.shape
    Lk = key.shape[1]
    hid = head_num * head_dims
    qp = query @ p["wq"] + p["bq"][0]
    kp = key @ p["wk"] + p["bk"][0]
    vp = value @ p["wv"] + p["bv"][0]

    def split(x):
        b, l, _ = x.shape
        return x.reshape(b, l, head_num, head_dims).transpose(0, 2, 1, 3)

    qh = split(qp) * (float(head_dims) ** -0.5)
    kh, vh = split(kp), split(vp)
    attn = jnp.einsum("bhqd,bhkd->bhqk", qh, kh)
    kpad = (key_mask == pad_idx)[:, None, None, :]
    attn = jnp.where(kpad, -jnp.inf, attn)
    if causality:
        cmask = jnp.triu(jnp.ones((Lq, Lk)), k=1)[None, None]
        attn = attn + jnp.where(cmask == 1, -jnp.inf, 0.0)
    attn = jax.nn.softmax(attn, axis=-1)
    out = jnp.einsum("bhqk,bhkd->bhqd", attn, vh)
    out = out.transpose(0, 2, 1, 3).reshape(B, Lq, hid)
    out = out @ p["wo"] + p["bo"][0]
    out = out * query_mask[:, :, None].astype(jnp.float32)
    return out


if __name__ == "__main__":
    # Small but lane-dense shapes that exercise query tiling, flash key tiling,
    # multiple heads, key padding and query masking.
    B = 2
    Lq = Lk = 256
    D = Dk = 128          # query_dims / key_dims
    H = 4                 # head_num
    Dh = D // H           # head_dims = 32
    hid = H * Dh

    root = jax.random.PRNGKey(0)
    kq, kk, kp = jax.random.split(root, 3)
    query = jax.random.normal(kq, (B, Lq, D), dtype=jnp.float32)
    keyx = jax.random.normal(kk, (B, Lk, Dk), dtype=jnp.float32)

    # Masks: key_mask compared to pad_idx=0 (masked out), query_mask multiplied.
    key_mask = jnp.ones((B, Lk), jnp.float32).at[1, 200:].set(0.0)
    query_mask = jnp.ones((B, Lq), jnp.float32).at[1, 240:].set(0.0)

    # Deterministic synthetic parameters; Conv1d(kernel_size=1) weights stored
    # transposed as (in_dim, out_dim).
    ks = jax.random.split(kp, 8)
    params = {
        "wq": 0.1 * jax.random.normal(ks[0], (D, hid), jnp.float32),
        "bq": 0.01 * jax.random.normal(ks[1], (1, hid), jnp.float32),
        "wk": 0.1 * jax.random.normal(ks[2], (Dk, hid), jnp.float32),
        "bk": 0.01 * jax.random.normal(ks[3], (1, hid), jnp.float32),
        "wv": 0.1 * jax.random.normal(ks[4], (Dk, hid), jnp.float32),
        "bv": 0.01 * jax.random.normal(ks[5], (1, hid), jnp.float32),
        "wo": 0.1 * jax.random.normal(ks[6], (hid, D), jnp.float32),
        "bo": 0.01 * jax.random.normal(ks[7], (1, D), jnp.float32),
    }

    common = dict(head_num=H, head_dims=Dh, pad_idx=0, block_q=128, block_k=128)
    ref = ref_forward(query, keyx, query_mask, key_mask, params,
                      head_num=H, head_dims=Dh, pad_idx=0)

    # 1) full-f32 MXU path: tight check of the algorithm against the reference.
    out_f32 = jax.block_until_ready(
        mha_forward(query, keyx, query_mask, key_mask, params,
                    matmul_dtype=None, **common))
    assert out_f32.shape == (B, Lq, D)
    err = jnp.max(jnp.abs(out_f32 - ref))
    assert jnp.allclose(out_f32, ref, atol=1e-4, rtol=1e-4), f"f32 max abs err={err}"

    # 2) default bf16-MXU path (f32 accumulation): looser numerical tolerance.
    out_bf16 = jax.block_until_ready(
        mha_forward(query, keyx, query_mask, key_mask, params, **common))
    err_bf = jnp.max(jnp.abs(out_bf16 - ref))
    assert jnp.allclose(out_bf16, ref, atol=5e-2, rtol=5e-2), f"bf16 max abs err={err_bf}"

    # 3) causal variant (f32) validates the hoisted, tile-offset causal bias.
    out_c = jax.block_until_ready(
        mha_forward(query, keyx, query_mask, key_mask, params,
                    matmul_dtype=None, causality=True, **common))
    ref_c = ref_forward(query, keyx, query_mask, key_mask, params,
                        head_num=H, head_dims=Dh, pad_idx=0, causality=True)
    err_c = jnp.max(jnp.abs(out_c - ref_c))
    assert jnp.allclose(out_c, ref_c, atol=1e-4, rtol=1e-4), f"causal max abs err={err_c}"

    print("KERNEL_OK")
</pallas_src>

<mosaic_0001>
module attributes {stable_mosaic.version = 11 : i64} {
  func.func @kv_proj_kernel(%arg0: i32, %arg1: i32, %arg2: memref<1x128x128xf32, #tpu.memory_space<vmem>>, %arg3: memref<1x128x128xf32, #tpu.memory_space<vmem>>, %arg4: memref<128x128xf32, #tpu.memory_space<vmem>>, %arg5: memref<1x128xf32, #tpu.memory_space<vmem>>, %arg6: memref<128x128xf32, #tpu.memory_space<vmem>>, %arg7: memref<1x128xf32, #tpu.memory_space<vmem>>, %arg8: memref<1x128x128xf32, #tpu.memory_space<vmem>>, %arg9: memref<1x128x128xf32, #tpu.memory_space<vmem>>) attributes {dimension_semantics = [#tpu.dimension_semantics<parallel>, #tpu.dimension_semantics<parallel>], iteration_bounds = array<i64: 2, 2>, scalar_prefetch = 0 : i64, scratch_operands = 0 : i64, tpu.core_type = #tpu.core_type<tc>, window_params = [{transform_indices = @transform_0, window_bounds = array<i64: 1, 128, 128>}, {transform_indices = @transform_1, window_bounds = array<i64: 1, 128, 128>}, {pipeline_mode = #tpu.pipeline_mode<synchronous>, transform_indices = @transform_2, window_bounds = array<i64: 128, 128>}, {pipeline_mode = #tpu.pipeline_mode<synchronous>, transform_indices = @transform_3, window_bounds = array<i64: 1, 128>}, {pipeline_mode = #tpu.pipeline_mode<synchronous>, transform_indices = @transform_4, window_bounds = array<i64: 128, 128>}, {pipeline_mode = #tpu.pipeline_mode<synchronous>, transform_indices = @transform_5, window_bounds = array<i64: 1, 128>}, {transform_indices = @transform_6, window_bounds = array<i64: 1, 128, 128>}, {transform_indices = @transform_7, window_bounds = array<i64: 1, 128, 128>}]} {
    %c0 = arith.constant 0 : index
    %c0_0 = arith.constant 0 : index
    %c0_1 = arith.constant 0 : index
    %0 = vector.load %arg2[%c0, %c0_0, %c0_1] : memref<1x128x128xf32, #tpu.memory_space<vmem>>, vector<1x128x128xf32>
    %1 = vector.shape_cast %0 : vector<1x128x128xf32> to vector<128x128xf32>
    %c0_2 = arith.constant 0 : index
    %c0_3 = arith.constant 0 : index
    %2 = vector.load %arg4[%c0_2, %c0_3] : memref<128x128xf32, #tpu.memory_space<vmem>>, vector<128x128xf32>
    %cst = arith.constant dense<0.000000e+00> : vector<128x128xf32>
    %3 = tpu.matmul %1, %2, %cst {dimension_numbers = #tpu.dot_dimension_numbers<[1], [0], [0], [1], [0, 0, 1, 1], [], []>} : vector<128x128xf32>, vector<128x128xf32>, vector<128x128xf32> -> vector<128x128xf32>
    %c0_4 = arith.constant 0 : index
    %c0_5 = arith.constant 0 : index
    %4 = vector.load %arg5[%c0_4, %c0_5] : memref<1x128xf32, #tpu.memory_space<vmem>>, vector<1x128xf32>
    %5 = vector.broadcast %4 : vector<1x128xf32> to vector<128x128xf32>
    %6 = arith.addf %3, %5 : vector<128x128xf32>
    %c0_6 = arith.constant 0 : index
    %c0_7 = arith.constant 0 : index
    %c0_8 = arith.constant 0 : index
    %7 = vector.load %arg8[%c0_6, %c0_7, %c0_8] : memref<1x128x128xf32, #tpu.memory_space<vmem>>, vector<1x128x128xf32>
    %8 = vector.shape_cast %7 : vector<1x128x128xf32> to vector<128x128xf32>
    %9 = vector.shape_cast %6 : vector<128x128xf32> to vector<1x128x128xf32>
    tpu.vector_store %arg8[%c0_6, %c0_7, %c0_8], %9 {strides = array<i32>} : memref<1x128x128xf32, #tpu.memory_space<vmem>>, vector<1x128x128xf32>,
    %c0_9 = arith.constant 0 : index
    %c0_10 = arith.constant 0 : index
    %c0_11 = arith.constant 0 : index
    %10 = vector.load %arg3[%c0_9, %c0_10, %c0_11] : memref<1x128x128xf32, #tpu.memory_space<vmem>>, vector<1x128x128xf32>
    %11 = vector.shape_cast %10 : vector<1x128x128xf32> to vector<128x128xf32>
    %c0_12 = arith.constant 0 : index
    %c0_13 = arith.constant 0 : index
    %12 = vector.load %arg6[%c0_12, %c0_13] : memref<128x128xf32, #tpu.memory_space<vmem>>, vector<128x128xf32>
    %cst_14 = arith.constant dense<0.000000e+00> : vector<128x128xf32>
    %13 = tpu.matmul %11, %12, %cst_14 {dimension_numbers = #tpu.dot_dimension_numbers<[1], [0], [0], [1], [0, 0, 1, 1], [], []>} : vector<128x128xf32>, vector<128x128xf32>, vector<128x128xf32> -> vector<128x128xf32>
    %c0_15 = arith.constant 0 : index
    %c0_16 = arith.constant 0 : index
    %14 = vector.load %arg7[%c0_15, %c0_16] : memref<1x128xf32, #tpu.memory_space<vmem>>, vector<1x128xf32>
    %15 = vector.broadcast %14 : vector<1x128xf32> to vector<128x128xf32>
    %16 = arith.addf %13, %15 : vector<128x128xf32>
    %c0_17 = arith.constant 0 : index
    %c0_18 = arith.constant 0 : index
    %c0_19 = arith.constant 0 : index
    %17 = vector.load %arg9[%c0_17, %c0_18, %c0_19] : memref<1x128x128xf32, #tpu.memory_space<vmem>>, vector<1x128x128xf32>
    %18 = vector.shape_cast %17 : vector<1x128x128xf32> to vector<128x128xf32>
    %19 = vector.shape_cast %16 : vector<128x128xf32> to vector<1x128x128xf32>
    tpu.vector_store %arg9[%c0_17, %c0_18, %c0_19], %19 {strides = array<i32>} : memref<1x128x128xf32, #tpu.memory_space<vmem>>, vector<1x128x128xf32>,
    return
  }
  func.func @transform_0(%arg0: i32, %arg1: i32) -> (i32, i32, i32) {
    %c0_i32 = arith.constant 0 : i32
    %c0_i32_0 = arith.constant 0 : i32
    return %arg0, %arg1, %c0_i32 : i32, i32, i32
  }
  func.func @transform_1(%arg0: i32, %arg1: i32) -> (i32, i32, i32) {
    %c0_i32 = arith.constant 0 : i32
    %c0_i32_0 = arith.constant 0 : i32
    return %arg0, %arg1, %c0_i32 : i32, i32, i32
  }
  func.func @transform_2(%arg0: i32, %arg1: i32) -> (i32, i32) {
    %c0_i32 = arith.constant 0 : i32
    %c0_i32_0 = arith.constant 0 : i32
    %c0_i32_1 = arith.constant 0 : i32
    return %c0_i32, %c0_i32_0 : i32, i32
  }
  func.func @transform_3(%arg0: i32, %arg1: i32) -> (i32, i32) {
    %c0_i32 = arith.constant 0 : i32
    %c0_i32_0 = arith.constant 0 : i32
    %c0_i32_1 = arith.constant 0 : i32
    return %c0_i32, %c0_i32_0 : i32, i32
  }
  func.func @transform_4(%arg0: i32, %arg1: i32) -> (i32, i32) {
    %c0_i32 = arith.constant 0 : i32
    %c0_i32_0 = arith.constant 0 : i32
    %c0_i32_1 = arith.constant 0 : i32
    return %c0_i32, %c0_i32_0 : i32, i32
  }
  func.func @transform_5(%arg0: i32, %arg1: i32) -> (i32, i32) {
    %c0_i32 = arith.constant 0 : i32
    %c0_i32_0 = arith.constant 0 : i32
    %c0_i32_1 = arith.constant 0 : i32
    return %c0_i32, %c0_i32_0 : i32, i32
  }
  func.func @transform_6(%arg0: i32, %arg1: i32) -> (i32, i32, i32) {
    %c0_i32 = arith.constant 0 : i32
    %c0_i32_0 = arith.constant 0 : i32
    return %arg0, %arg1, %c0_i32 : i32, i32, i32
  }
  func.func @transform_7(%arg0: i32, %arg1: i32) -> (i32, i32, i32) {
    %c0_i32 = arith.constant 0 : i32
    %c0_i32_0 = arith.constant 0 : i32
    return %arg0, %arg1, %c0_i32 : i32, i32, i32
  }
}

</mosaic_0001>

<bundles_post_ra>
// kernel: tpu_custom_call.1
= control target key start
LH: loop header
LB: loop body
LE: loop exit
PB: predicated region body
PF: predicated region fallthrough
CT: control target
= control target key end

     0   :  { %s1691_s0 = inlined_call_operand.hbm [shape: f32[2,256,128], index: 0, kind: input, shape index: {}]   ;;  %s1692_s1 = inlined_call_operand.hbm [shape: f32[2,256,128], index: 1, kind: input, shape index: {}]   ;;  %s1693_s2 = inlined_call_operand.hbm [shape: f32[128,128], index: 2, kind: input, shape index: {}]   ;;  %s1694_s3 = inlined_call_operand.vmem [shape: f32[1,128], index: 3, kind: input, shape index: {}]   ;;  %s1695_s4 = inlined_call_operand.hbm [shape: f32[128,128], index: 4, kind: input, shape index: {}]   ;;  %s1696_s5 = inlined_call_operand.vmem [shape: f32[1,128], index: 5, kind: input, shape index: {}]   ;;  %s1697_s6 = inlined_call_operand.hbm [shape: f32[2,256,128], index: 6, kind: output, shape index: {0}]   ;;  %s1698_s7 = inlined_call_operand.hbm [shape: f32[2,256,128], index: 7, kind: output, shape index: {1}]  }
   0x1   :  { %1712 = sst [smem:[#allocation26_spill]] %s1693_s2 }
   0x2   :  { %1713 = sst [smem:[#allocation27_spill]] %s1695_s4 }
   0x3   :  { %1714 = sst [smem:[#allocation28_spill]] %s1697_s6 }
   0x4   :  { %1715 = sst [smem:[#allocation29_spill]] %s1698_s7 }
   0x5   :  { %13 = vsyncpa [#allocation3], 0 }
   0x6   :  { %15 = vsyncpa [#allocation3 + $0x1], 0 }
   0x7   :  { %16 = vsyncpa [#allocation6], 0 }
   0x8   :  { %18 = vsyncpa [#allocation6 + $0x1], 0 }
   0x9   :  { %19 = vsyncpa [#allocation9], 0 }
   0xa   :  { %20 = vsyncpa [#allocation4], 0 }
   0xb   :  { %22 = vsyncpa [#allocation4 + $0x1], 0 }
   0xc   :  { %23 = vsyncpa [#allocation12], 0 }
   0xd   :  { %25 = vsyncpa [#allocation12 + $0x1], 0  ;;  %s1348_s24 = smov 0   ;;  %s1350_s25 = smov 0  }
   0xe   :  { %s1352_s26 = smov 0   ;;  %s1354_s27 = smov 0  }
   0xf   :  { %s1356_s28 = smov 0   ;;  %s1358_s29 = smov 0  }
  0x10   :  { %s1360_s30 = smov 0   ;;  %s1362_s8 = smov 0  }
  0x11 LB: > { %1716 = sst [smem:[#allocation19_spill]] %s1272_s24  ;;  %s1389_s9 = sadd.s32 4294967295, %s1300_s8   ;;  %s1300_s8 = sphi %s1362_s8, %s31_s8   ;;  %s1296_s30 = sphi %s1360_s30, %s1742_s30   ;;  %s1292_s29 = sphi %s1358_s29, %s1747_s29   ;;  %s1288_s28 = sphi %s1356_s28, %s1740_s28   ;;  %s1284_s27 = sphi %s1354_s27, %s1746_s27   ;;  %s1280_s26 = sphi %s1352_s26, %s1745_s26   ;;  %s1276_s25 = sphi %s1350_s25, %s1744_s25   ;;  %s1272_s24 = sphi %s1348_s24, %s1743_s24  }
  0x12   : > { %1717 = sst [smem:[#allocation20_spill]] %s1288_s28  ;;  %s861_s10 = sadd.s32 4294967294, %s1300_s8  }
  0x13   : > { %1718 = sst [smem:[#allocation21_spill]] %s1296_s30  ;;  %p65_p0 = scmp.ne.s32.totalorder %s1276_s25, %s1272_s24 }
  0x14   : > { %p66_p1 = scmp.eq.s32.totalorder %s1389_s9, 0  ;;  %p203_p2 = scmp.eq.s32.totalorder %s1389_s9, 3 }
  0x15   : > { %p209_p3 = scmp.eq.s32.totalorder %s861_s10, 3  ;;  %p862_p5 = scmp.ge.s32.totalorder %s1300_s8, 1 }
  0x16   : > { %p1398_p4 = por %p66_p1, %p65_p0  ;;  %p244_p7 = scmp.lt.s32.totalorder %s1300_s8, 5 }
  0x17   : > { %p1403_p6 = por %p209_p3, %p65_p0  ;;  %s1722_s2 = sld [smem:[#allocation26_spill]] }
  0x18   : > { %p1411_p8 = pnand %p862_p5, %p244_p7  ;;  %s1302_s17 = smov [#allocation7]  }
  0x19   : > { %s1720_s12 = scalar_select %p1403_p6, 1, 0 }
  0x1a   : > { %p939_p9 = pneg %p1411_p8  ;;  %s257_s18 = sshll.u32 %s1302_s17, 4  ;;  %s258_s18 = int_to_ptr.vmem [resolvable:$true] %s257_s18 }
  0x1b   : > { %1721 = sst [smem:[#allocation22_spill]] %s1720_s12  ;;  %s1699_s22 = smov 128  }
  0x1c   : > { %p940_p10 = pnand %p939_p9, %p66_p1  ;;  %s1724_s4 = sld [smem:[#allocation27_spill]] }
  0x1d   : > { %s255_s15 = sshll.u32 %s1722_s2, 4  ;;  %s1701_s23 = smov 8   ;;  %s256_s15 = int_to_ptr.hbm [resolvable:$true] %s255_s15 }
  0x1e   : > { %942 = dma.hbm_to_vmem [thread:$0]  (!%p940_p10), %s256_s15, 2048, %s258_s18, [#allocation6], %s1699_s22, %s1699_s22, %s1701_s23  }
  0x1f   : > { %s1305_s10 = smov [#allocation8]   ;;  %s40_s14 = sadd.s32 1, %s1292_s29 }
  0x20   : > { %s274_s13 = sshll.u32 %s1305_s10, 4  ;;  %s43_s17 = sadd.s32 1, %s1296_s30  ;;  %s275_s13 = int_to_ptr.vmem [resolvable:$true] %s274_s13 }
  0x21   : > { %p41_p11 = scmp.ge.s32.totalorder %s40_s14, 2  ;;  %s52_s19 = sadd.s32 1, %s1280_s26 }
  0x22   : > { %s272_s21 = sshll.u32 %s1724_s4, 4  ;;  %p59_p12 = scmp.ne.s32.totalorder %s1280_s26, %s1276_s25  ;;  %s273_s21 = int_to_ptr.hbm [resolvable:$true] %s272_s21 }
  0x23   : > { %945 = dma.hbm_to_vmem [thread:$0]  (!%p940_p10), %s273_s21, 2048, %s275_s13, [#allocation9], %s1699_s22, %s1699_s22, %s1701_s23  }
  0x24   : > { %p60_p13 = scmp.eq.s32.totalorder %s1300_s8, 0  ;;  %s1749_s14 = smov (%p41_p11, %s40_s14), 0 }
  0x25   : > { %1725 = sst [smem:[#allocation23_spill]] %s1749_s14  ;;  %s1751_s17 = smov (!%p41_p11, %s43_s17), %s1296_s30 }
  0x26   : > { %s48_s15 = ssub.s32 %s1292_s29, %s1749_s14  ;;  %p1439_p0 = por %p60_p13, %p59_p12 }
  0x27   : > { %p45_p3 = scmp.ge.s32.totalorder %s1751_s17, 2  ;;  %p1445_p5 = por %p203_p2, %p59_p12 }
  0x28   : > { %p962_p7 = scmp.lt.s32.totalorder %s1300_s8, 4  ;;  %s291_s21 = sand.u32 1, %s1280_s26  }
  0x29   : > { %s1727_s20 = scalar_select %p1445_p5, 1, 0 }
  0x2a   : > { %s1753_s17 = smov (%p45_p3, %s1751_s17), 0  ;;  %s866_s10 = sshll.u32 %s291_s21, 7 }
  0x2b   : > { %1728 = sst [smem:[#allocation24_spill]] %s1727_s20  ;;  %s47_s13 = ssub.s32 %s1296_s30, %s1753_s17 }
  0x2c   : > { %1729 = sst [smem:[#allocation25_spill]] %s1753_s17  ;;  %s49_s22 = sor.u32 %s48_s15, %s47_s13 }
  0x2d   : > { %s867_s23 = sshll.u32 %s1292_s29, 4  ;;  %p50_p9 = scmp.eq.s32.totalorder %s49_s22, 0 }
  0x2e   : > { %s868_s2 = sshll.u32 %s1296_s30, 5  ;;  %s295_s14 = scalar_lea.vmem [#allocation2], %s866_s10 }
  0x2f   : > { %s300_s4 = sadd.s32 %s868_s2, %s867_s23  ;;  %s305_s12 = sshll.u32 %s295_s14, 4  ;;  %s306_s12 = int_to_ptr.vmem [resolvable:$true] %s305_s12 }
  0x30   : > { %s1458_s24 = scalar_select %p50_p9, %s1280_s26, %s52_s19  }
  0x31   : > { %s869_s20 = sshll.u32 %s300_s4, 3  ;;  %p947_p2 = pnand %p962_p7, %p1439_p0 }
  0x32   : > { %s302_s28 = scalar_lea.hbm %s1691_s0, %s869_s20  ;;  %s292_s15 = scalar_lea.sflag [#allocation3], %s291_s21 }
  0x33   : > { %s303_s17 = sshll.u32 %s302_s28, 4  ;;  %s1730_s22 = smov 8   ;;  %s304_s17 = int_to_ptr.hbm [resolvable:$true] %s303_s17 }
  0x34   : > { %s1731_s13 = smov 128   ;;  %s326_s14 = scalar_lea.hbm %s1692_s1, %s869_s20 }
  0x35   : > { %949 = dma.hbm_to_vmem [thread:$0]  (!%p947_p2), %s304_s17, 2048, %s306_s12, %s292_s15, %s1731_s13, %s1731_s13, %s1730_s22  }
  0x36   : > { %s319_s4 = scalar_lea.vmem [#allocation5], %s866_s10  ;;  %s327_s30 = sshll.u32 %s326_s14, 4  ;;  %s328_s30 = int_to_ptr.hbm [resolvable:$true] %s327_s30 }
  0x37   : > { %s329_s19 = sshll.u32 %s319_s4, 4  ;;  %s315_s6 = sand.u32 1, %s1300_s8   ;;  %s330_s19 = int_to_ptr.vmem [resolvable:$true] %s329_s19 }
  0x38   : > { %s316_s7 = scalar_lea.sflag [#allocation6], %s315_s6  ;;  %341 = sbr.rel (%p1411_p8) target bundleno = 308 (0x134), region = 44 }
  0x39   : > { %952 = dma.hbm_to_vmem [thread:$0]  (!%p947_p2), %s328_s30, 2048, %s330_s19, %s316_s7, %s1731_s13, %s1731_s13, %s1730_s22  }
  0x3a   : > { %s1480_s28 = sand.u32 (!%p1411_p8), 1, %s1276_s25  }
  0x3b   : > { %s1483_s12 = sshll.u32 (!%p1411_p8), %s1480_s28, 7  ;;  %s344_s17 = scalar_lea.sflag (!%p1411_p8), [#allocation3], %s1480_s28 }
  0x3c   : > { %s1487_s18 = scalar_lea.vmem (!%p1411_p8), [#allocation2], %s1483_s12 }
  0x3d   : > { %1247 = dma.done.wait (%p1398_p4), %s344_s17, 2048  }
  0x3e   : > { %1249 = vsyncadd (%p1398_p4), %s344_s17, 4294965248  ;;  %s353_s30 = sand.u32 1, %s1389_s9   ;;  %s1495_s20 = scalar_lea.vmem [#allocation5], %s1483_s12 }
  0x3f   : > { %s354_s16 = scalar_lea.sflag [#allocation6], %s353_s30 }
  0x40   : > { %1251 = dma.done.wait (%p1398_p4), %s354_s16, 2048  }
  0x41   : > { %1253 = vsyncadd (%p1398_p4), %s354_s16, 4294965248 }
  0x42   : > { %1255 = dma.done.wait (%p66_p1), [#allocation6], 2048  }
  0x43   : > { %1257 = vsyncadd (%p66_p1), [#allocation6], 4294965248 }
  0x44   : > { %1259 = dma.done.wait (%p66_p1), [#allocation9], 2048  }
  0x45   : > { %1261 = vsyncadd (%p66_p1), [#allocation9], 4294965248  ;;  %v444_v0 = vld [vmem:[#allocation7 + $0x78] sm:$0xff]  ;;  %v443_v2 = vld [vmem:[#allocation7 + $0x70] sm:$0xff]  ;;  %s1554_s15 = scalar_lea.vmem [#allocation10], %s1483_s12  ;;  %s1558_s22 = scalar_lea.vmem [#allocation11], %s1483_s12 }
  0x46   : > { %v561_v1 = vld [vmem:[#allocation8 + $0x78] sm:$0xff]  ;;  %891 = vmatpush.msra.mxu2 %v444_v0  ;;  %v560_v3 = vld [vmem:[#allocation8 + $0x70] sm:$0xff]  ;;  %v442_v4 = vld [vmem:[#allocation7 + $0x68] sm:$0xff]  ;;  %449 = vmatpush.msra.mxu0 %v444_v0  ;;  %s1732_s13 = sld [smem:[#allocation20_spill]]  ;;  %s883_s2 = sshll.u32 %s1284_s27, 4 }
  0x47   : > { %907 = vmatpush.msra.mxu3 %v561_v1  ;;  %v559_v5 = vld [vmem:[#allocation8 + $0x68] sm:$0xff]  ;;  %566 = vmatpush.msra.mxu1 %v561_v1  ;;  %v441_v6 = vld [vmem:[#allocation7 + $0x60] sm:$0xff]  ;;  %v440_v8 = vld [vmem:[#allocation7 + $0x58] sm:$0xff]  ;;  %s1733_s6 = sld [smem:[#allocation28_spill]]  ;;  %s667_s12 = sshll.u32 %s1554_s15, 4  ;;  %s1625_s12 = int_to_ptr.vmem [resolvable:$true] %s667_s12 }
  0x48   : > { %892 = vmatpush.msra.mxu2 %v443_v2  ;;  %v558_v7 = vld [vmem:[#allocation8 + $0x60] sm:$0xff]  ;;  %450 = vmatpush.msra.mxu0 %v443_v2  ;;  %v557_v9 = vld [vmem:[#allocation8 + $0x58] sm:$0xff]  ;;  %v439_v10 = vld [vmem:[#allocation7 + $0x50] sm:$0xff]  ;;  %s1734_s30 = sld [smem:[#allocation29_spill]]  ;;  %s686_s21 = sshll.u32 %s1558_s22, 4  ;;  %s1632_s21 = int_to_ptr.vmem [resolvable:$true] %s686_s21 }
  0x49   : > { %908 = vmatpush.msra.mxu3 %v560_v3  ;;  %567 = vmatpush.msra.mxu1 %v560_v3  ;;  %v556_v11 = vld [vmem:[#allocation8 + $0x50] sm:$0xff]  ;;  %v438_v12 = vld [vmem:[#allocation7 + $0x48] sm:$0xff]  ;;  %v437_v14 = vld [vmem:[#allocation7 + $0x40] sm:$0xff] }
  0x4a   : > { %893 = vmatpush.msra.mxu2 %v442_v4  ;;  %451 = vmatpush.msra.mxu0 %v442_v4  ;;  %v555_v13 = vld [vmem:[#allocation8 + $0x48] sm:$0xff]  ;;  %v554_v15 = vld [vmem:[#allocation8 + $0x40] sm:$0xff]  ;;  %v436_v16 = vld [vmem:[#allocation7 + $0x38] sm:$0xff] }
  0x4b   : > { %909 = vmatpush.msra.mxu3 %v559_v5  ;;  %568 = vmatpush.msra.mxu1 %v559_v5  ;;  %v553_v17 = vld [vmem:[#allocation8 + $0x38] sm:$0xff]  ;;  %v435_v18 = vld [vmem:[#allocation7 + $0x30] sm:$0xff]  ;;  %v434_v20 = vld [vmem:[#allocation7 + $0x28] sm:$0xff] }
  0x4c   : > { %894 = vmatpush.msra.mxu2 %v441_v6  ;;  %452 = vmatpush.msra.mxu0 %v441_v6  ;;  %v552_v19 = vld [vmem:[#allocation8 + $0x30] sm:$0xff]  ;;  %v551_v21 = vld [vmem:[#allocation8 + $0x28] sm:$0xff]  ;;  %v433_v22 = vld [vmem:[#allocation7 + $0x20] sm:$0xff]  ;;  %s884_s23 = sshll.u32 %s1732_s13, 5  ;;  %s648_s13 = scalar_lea.sflag [#allocation4], %s1480_s28 }
  0x4d   : > { %910 = vmatpush.msra.mxu3 %v558_v7  ;;  %569 = vmatpush.msra.mxu1 %v558_v7  ;;  %v550_v23 = vld [vmem:[#allocation8 + $0x20] sm:$0xff]  ;;  %v432_v24 = vld [vmem:[#allocation7 + $0x18] sm:$0xff]  ;;  %v431_v26 = vld [vmem:[#allocation7 + $0x10] sm:$0xff]  ;;  %s664_s14 = sadd.s32 %s884_s23, %s883_s2  ;;  %s1178_s27 = scalar_lea.hbm %s1733_s6, 512 }
  0x4e   : > { %895 = vmatpush.msra.mxu2 %v440_v8  ;;  %453 = vmatpush.msra.mxu0 %v440_v8  ;;  %v549_v25 = vld [vmem:[#allocation8 + $0x18] sm:$0xff]  ;;  %v548_v27 = vld [vmem:[#allocation8 + $0x10] sm:$0xff]  ;;  %v430_v28 = vld [vmem:[#allocation7 + $0x8] sm:$0xff]  ;;  %s885_s4 = sshll.u32 %s664_s14, 3  ;;  %s1735_s16 = smov %s1734_s30 }
  0x4f   : > { %911 = vmatpush.msra.mxu3 %v557_v9  ;;  %570 = vmatpush.msra.mxu1 %v557_v9  ;;  %v547_v29 = vld [vmem:[#allocation8 + $0x8] sm:$0xff]  ;;  %v429_v30 = vld [vmem:[#allocation7] sm:$0xff]  ;;  %v423_v40 = vld [vmem:[%s1487_s18 + $0x50] sm:$0xff]  ;;  %s666_s7 = scalar_lea.hbm %s1733_s6, %s885_s4 }
  0x50   : > { %896 = vmatpush.msra.mxu2 %v439_v10  ;;  %454 = vmatpush.msra.mxu0 %v439_v10  ;;  %v546_v31 = vld [vmem:[#allocation8] sm:$0xff]  ;;  %v422_v36 = vld [vmem:[%s1487_s18 + $0x48] sm:$0xff]  ;;  %v540_v41 = vld [vmem:[%s1495_s20 + $0x50] sm:$0xff]  ;;  %s669_s9 = sshll.u32 %s666_s7, 4  ;;  %s670_s9 = int_to_ptr.hbm [resolvable:$true] %s669_s9 }
  0x51   : > { %912 = vmatpush.msra.mxu3 %v556_v11  ;;  %571 = vmatpush.msra.mxu1 %v556_v11  ;;  %v421_v32 = vld [vmem:[%s1487_s18 + $0x40] sm:$0xff]  ;;  %v539_v37 = vld [vmem:[%s1495_s20 + $0x48] sm:$0xff]  ;;  %v415_v42 = vld [vmem:[%s1487_s18 + $0x10] sm:$0xff]  ;;  %s1172_s2 = sshra.s32 %s670_s9, 4  ;;  %s1173_s2 = int_to_ptr.hbm [resolvable:$true] %s1172_s2 }
  0x52   : > { %897 = vmatpush.msra.mxu2 %v438_v12  ;;  %455 = vmatpush.msra.mxu0 %v438_v12  ;;  %v538_v33 = vld [vmem:[%s1495_s20 + $0x40] sm:$0xff]  ;;  %v414_v38 = vld [vmem:[%s1487_s18 + $0x8] sm:$0xff]  ;;  %v532_v43 = vld [vmem:[%s1495_s20 + $0x10] sm:$0xff]  ;;  %s1174_s23 = scalar_lea.hbm %s1173_s2, 128  ;;  %p1179_p10 = scmp.lt.s32.totalorder %s1173_s2, %s1733_s6 }
  0x53   : > { %913 = vmatpush.msra.mxu3 %v555_v13  ;;  %572 = vmatpush.msra.mxu1 %v555_v13  ;;  %v413_v34 = vld [vmem:[%s1487_s18] sm:$0xff]  ;;  %v531_v39 = vld [vmem:[%s1495_s20 + $0x8] sm:$0xff]  ;;  %v424_v44 = vld [vmem:[%s1487_s18 + $0x58] sm:$0xff]  ;;  %p1175_p1 = scmp.ne.s32.totalorder %s1173_s2, %s1174_s23  ;;  %p1180_p11 = scmp.lt.s32.totalorder %s1178_s27, %s1174_s23 }
  0x54   : > { %898 = vmatpush.msra.mxu2 %v437_v14  ;;  %456 = vmatpush.msra.mxu0 %v437_v14  ;;  %v530_v35 = vld [vmem:[%s1495_s20] sm:$0xff]  ;;  %v541_v45 = vld [vmem:[%s1495_s20 + $0x58] sm:$0xff]  ;;  %v426_v52 = vld [vmem:[%s1487_s18 + $0x68] sm:$0xff] }
  0x55   : > { %914 = vmatpush.msra.mxu3 %v554_v15  ;;  %573 = vmatpush.msra.mxu1 %v554_v15  ;;  %v416_v46 = vld [vmem:[%s1487_s18 + $0x18] sm:$0xff]  ;;  %v425_v48 = vld [vmem:[%s1487_s18 + $0x60] sm:$0xff]  ;;  %v543_v53 = vld [vmem:[%s1495_s20 + $0x68] sm:$0xff]  ;;  %p1176_p4 = pnand %p1175_p1, %p1445_p5  ;;  %p1181_p12 = por %p1180_p11, %p1179_p10 }
  0x56   : > { %899 = vmatpush.msra.mxu2 %v436_v16  ;;  %457 = vmatpush.msra.mxu0 %v436_v16  ;;  %v533_v47 = vld [vmem:[%s1495_s20 + $0x18] sm:$0xff]  ;;  %v542_v49 = vld [vmem:[%s1495_s20 + $0x60] sm:$0xff]  ;;  %v418_v54 = vld [vmem:[%s1487_s18 + $0x28] sm:$0xff] }
  0x57   : > { %915 = vmatpush.msra.mxu3 %v553_v17  ;;  %574 = vmatpush.msra.mxu1 %v553_v17  ;;  %v417_v50 = vld [vmem:[%s1487_s18 + $0x20] sm:$0xff]  ;;  %v535_v55 = vld [vmem:[%s1495_s20 + $0x28] sm:$0xff]  ;;  %v427_v56 = vld [vmem:[%s1487_s18 + $0x70] sm:$0xff]  ;;  %p1177_p8 = pneg %p1176_p4 }
  0x58   : > { %900 = vmatpush.msra.mxu2 %v435_v18  ;;  %458 = vmatpush.msra.mxu0 %v435_v18  ;;  %v534_v51 = vld [vmem:[%s1495_s20 + $0x20] sm:$0xff]  ;;  %v544_v57 = vld [vmem:[%s1495_s20 + $0x70] sm:$0xff]  ;;  %v428_v60 = vld [vmem:[%s1487_s18 + $0x78] sm:$0xff] }
  0x59   : > { %916 = vmatpush.msra.mxu3 %v552_v19  ;;  %575 = vmatpush.msra.mxu1 %v552_v19  ;;  %v419_v58 = vld [vmem:[%s1487_s18 + $0x30] sm:$0xff]  ;;  %v545_v61 = vld [vmem:[%s1495_s20 + $0x78] sm:$0xff]  ;;  %v1544_v0 = vld [vmem:[%s1694_s3] ss:$0 sm:$0xff]  ;;  %p1182_p13 = pnand %p1181_p12, %p1177_p8 }
  0x5a   : > { %901 = vmatpush.msra.mxu2 %v434_v20  ;;  %459 = vmatpush.msra.mxu0 %v434_v20  ;;  %v536_v59 = vld [vmem:[%s1495_s20 + $0x30] sm:$0xff]  ;;  %v420_v62 = vld [vmem:[%s1487_s18 + $0x38] sm:$0xff]  ;;  %v1549_v1 = vld [vmem:[%s1696_s5] ss:$0 sm:$0xff] }
  0x5b   : > { %917 = vmatpush.msra.mxu3 %v551_v21  ;;  %576 = vmatpush.msra.mxu1 %v551_v21  ;;  %v537_v63 = vld [vmem:[%s1495_s20 + $0x38] sm:$0xff]  ;;  %s685_s20 = scalar_lea.hbm %s1734_s30, %s885_s4 }
  0x5c   : > { %902 = vmatpush.msra.mxu2 %v433_v22  ;;  %460 = vmatpush.msra.mxu0 %v433_v22  ;;  %s688_s10 = sshll.u32 %s685_s20, 4  ;;  %s1634_s10 = int_to_ptr.hbm [resolvable:$true] %s688_s10 }
  0x5d   : > { %918 = vmatpush.msra.mxu3 %v550_v23  ;;  %577 = vmatpush.msra.mxu1 %v550_v23 }
  0x5e   : > { %903 = vmatpush.msra.mxu2 %v432_v24  ;;  %461 = vmatpush.msra.mxu0 %v432_v24 }
  0x5f   : > { %919 = vmatpush.msra.mxu3 %v549_v25  ;;  %578 = vmatpush.msra.mxu1 %v549_v25 }
  0x60   : > { %904 = vmatpush.msra.mxu2 %v431_v26  ;;  %462 = vmatpush.msra.mxu0 %v431_v26 }
  0x61   : > { %920 = vmatpush.msra.mxu3 %v548_v27  ;;  %579 = vmatpush.msra.mxu1 %v548_v27 }
  0x62   : > { %905 = vmatpush.msra.mxu2 %v430_v28  ;;  %463 = vmatpush.msra.mxu0 %v430_v28 }
  0x63   : > { %921 = vmatpush.msra.mxu3 %v547_v29  ;;  %580 = vmatpush.msra.mxu1 %v547_v29 }
  0x64   : > { %906 = vmatpush.msra.mxu2 %v429_v30  ;;  %464 = vmatpush.msra.mxu0 %v429_v30 }
  0x65   : > { %922 = vmatpush.msra.mxu3 %v546_v31  ;;  %489 = vmatmul.f32.vlgmr.msra.gmra.mxu2 %v421_v32 }
  0x66   : > { %606 = vmatmul.f32.vlgmr.msra.gmra.mxu3 %v538_v33  ;;  %581 = vmatpush.msra.mxu1 %v546_v31 }
  0x67   : > { %465 = vmatmul.f32.vlgmr.msra.gmra.mxu0 %v413_v34  ;;  %582 = vmatmul.f32.vlgmr.msra.gmra.mxu1 %v530_v35 }
  0x6d   : > { %492 = vmatmul.f32.gmra.mxu2 %v422_v36 }
  0x6e   : > { %609 = vmatmul.f32.gmra.mxu3 %v539_v37 }
  0x6f   : > { %468 = vmatmul.f32.gmra.mxu0 %v414_v38  ;;  %585 = vmatmul.f32.gmra.mxu1 %v531_v39 }
  0x75   : > { %495 = vmatmul.f32.gmra.mxu2 %v423_v40 }
  0x76   : > { %612 = vmatmul.f32.gmra.mxu3 %v540_v41 }
  0x77   : > { %471 = vmatmul.f32.gmra.mxu0 %v415_v42  ;;  %588 = vmatmul.f32.gmra.mxu1 %v532_v43 }
  0x7d   : > { %498 = vmatmul.f32.gmra.mxu2 %v424_v44 }
  0x7e   : > { %615 = vmatmul.f32.gmra.mxu3 %v541_v45 }
  0x7f   : > { %474 = vmatmul.f32.gmra.mxu0 %v416_v46  ;;  %591 = vmatmul.f32.gmra.mxu1 %v533_v47 }
  0x85   : > { %501 = vmatmul.f32.gmra.mxu2 %v425_v48 }
  0x86   : > { %618 = vmatmul.f32.gmra.mxu3 %v542_v49 }
  0x87   : > { %477 = vmatmul.f32.gmra.mxu0 %v417_v50  ;;  %594 = vmatmul.f32.gmra.mxu1 %v534_v51 }
  0x8d   : > { %504 = vmatmul.f32.gmra.mxu2 %v426_v52 }
  0x8e   : > { %621 = vmatmul.f32.gmra.mxu3 %v543_v53 }
  0x8f   : > { %480 = vmatmul.f32.gmra.mxu0 %v418_v54  ;;  %597 = vmatmul.f32.gmra.mxu1 %v535_v55 }
  0x95   : > { %507 = vmatmul.f32.gmra.mxu2 %v427_v56 }
  0x96   : > { %624 = vmatmul.f32.gmra.mxu3 %v544_v57 }
  0x97   : > { %483 = vmatmul.f32.gmra.mxu0 %v419_v58  ;;  %600 = vmatmul.f32.gmra.mxu1 %v536_v59 }
  0x9d   : > { %510 = vmatmul.f32.gmra.mxu2 %v428_v60 }
  0x9e   : > { %627 = vmatmul.f32.gmra.mxu3 %v545_v61 }
  0x9f   : > { %486 = vmatmul.f32.gmra.mxu0 %v420_v62  ;;  %603 = vmatmul.f32.gmra.mxu1 %v537_v63 }
  0xe4   : > { %v466_v2 = vpop.f32.mrf.mxu0  ;;  %v583_v3 = vpop.f32.mrf.mxu1 }
  0xe5   : > { %v467_v4 = vadd.f32 %v1544_v0, %v466_v2  ;;  %v584_v5 = vadd.f32 %v1549_v1, %v583_v3 }
  0xe7   : > { %514 = vst [vmem:[%s1554_s15] sm:$0xff] %v467_v4 }
  0xe8   : > { %v490_v6 = vpop.f32.mrf.mxu2  ;;  %631 = vst [vmem:[%s1558_s22] sm:$0xff] %v584_v5 }
  0xe9   : > { %v607_v7 = vpop.f32.mrf.mxu3  ;;  %v491_v8 = vadd.f32 %v1544_v0, %v490_v6 }
  0xea   : > { %v608_v9 = vadd.f32 %v1549_v1, %v607_v7 }
  0xeb   : > { %522 = vst [vmem:[%s1554_s15 + $0x40] sm:$0xff] %v491_v8 }
  0xec   : > { %639 = vst [vmem:[%s1558_s22 + $0x40] sm:$0xff] %v608_v9  ;;  %v469_v10 = vpop.f32.mrf.mxu0  ;;  %v586_v11 = vpop.f32.mrf.mxu1 }
  0xed   : > { %v470_v12 = vadd.f32 %v1544_v0, %v469_v10  ;;  %v587_v13 = vadd.f32 %v1549_v1, %v586_v11 }
  0xef   : > { %515 = vst [vmem:[%s1554_s15 + $0x8] sm:$0xff] %v470_v12 }
  0xf0   : > { %v493_v14 = vpop.f32.mrf.mxu2  ;;  %632 = vst [vmem:[%s1558_s22 + $0x8] sm:$0xff] %v587_v13 }
  0xf1   : > { %v610_v15 = vpop.f32.mrf.mxu3  ;;  %v494_v16 = vadd.f32 %v1544_v0, %v493_v14 }
  0xf2   : > { %v611_v17 = vadd.f32 %v1549_v1, %v610_v15 }
  0xf3   : > { %523 = vst [vmem:[%s1554_s15 + $0x48] sm:$0xff] %v494_v16 }
  0xf4   : > { %640 = vst [vmem:[%s1558_s22 + $0x48] sm:$0xff] %v611_v17  ;;  %v472_v18 = vpop.f32.mrf.mxu0  ;;  %v589_v19 = vpop.f32.mrf.mxu1 }
  0xf5   : > { %v473_v20 = vadd.f32 %v1544_v0, %v472_v18  ;;  %v590_v21 = vadd.f32 %v1549_v1, %v589_v19 }
  0xf7   : > { %516 = vst [vmem:[%s1554_s15 + $0x10] sm:$0xff] %v473_v20 }
  0xf8   : > { %v496_v22 = vpop.f32.mrf.mxu2  ;;  %633 = vst [vmem:[%s1558_s22 + $0x10] sm:$0xff] %v590_v21 }
  0xf9   : > { %v613_v23 = vpop.f32.mrf.mxu3  ;;  %v497_v24 = vadd.f32 %v1544_v0, %v496_v22 }
  0xfa   : > { %v614_v25 = vadd.f32 %v1549_v1, %v613_v23 }
  0xfb   : > { %524 = vst [vmem:[%s1554_s15 + $0x50] sm:$0xff] %v497_v24 }
  0xfc   : > { %641 = vst [vmem:[%s1558_s22 + $0x50] sm:$0xff] %v614_v25  ;;  %v475_v26 = vpop.f32.mrf.mxu0  ;;  %v592_v27 = vpop.f32.mrf.mxu1 }
  0xfd   : > { %v476_v28 = vadd.f32 %v1544_v0, %v475_v26  ;;  %v593_v29 = vadd.f32 %v1549_v1, %v592_v27 }
  0xff   : > { %517 = vst [vmem:[%s1554_s15 + $0x18] sm:$0xff] %v476_v28 }
 0x100   : > { %v499_v30 = vpop.f32.mrf.mxu2  ;;  %634 = vst [vmem:[%s1558_s22 + $0x18] sm:$0xff] %v593_v29 }
 0x101   : > { %v616_v31 = vpop.f32.mrf.mxu3  ;;  %v500_v32 = vadd.f32 %v1544_v0, %v499_v30 }
 0x102   : > { %v617_v33 = vadd.f32 %v1549_v1, %v616_v31 }
 0x103   : > { %525 = vst [vmem:[%s1554_s15 + $0x58] sm:$0xff] %v500_v32 }
 0x104   : > { %642 = vst [vmem:[%s1558_s22 + $0x58] sm:$0xff] %v617_v33  ;;  %v478_v34 = vpop.f32.mrf.mxu0  ;;  %v595_v35 = vpop.f32.mrf.mxu1 }
 0x105   : > { %v479_v36 = vadd.f32 %v1544_v0, %v478_v34  ;;  %v596_v37 = vadd.f32 %v1549_v1, %v595_v35 }
 0x107   : > { %518 = vst [vmem:[%s1554_s15 + $0x20] sm:$0xff] %v479_v36 }
 0x108   : > { %v502_v38 = vpop.f32.mrf.mxu2  ;;  %635 = vst [vmem:[%s1558_s22 + $0x20] sm:$0xff] %v596_v37 }
 0x109   : > { %v619_v39 = vpop.f32.mrf.mxu3  ;;  %v503_v40 = vadd.f32 %v1544_v0, %v502_v38 }
 0x10a   : > { %v620_v41 = vadd.f32 %v1549_v1, %v619_v39 }
 0x10b   : > { %526 = vst [vmem:[%s1554_s15 + $0x60] sm:$0xff] %v503_v40 }
 0x10c   : > { %643 = vst [vmem:[%s1558_s22 + $0x60] sm:$0xff] %v620_v41  ;;  %v481_v42 = vpop.f32.mrf.mxu0  ;;  %v598_v43 = vpop.f32.mrf.mxu1 }
 0x10d   : > { %v482_v44 = vadd.f32 %v1544_v0, %v481_v42  ;;  %v599_v45 = vadd.f32 %v1549_v1, %v598_v43 }
 0x10f   : > { %519 = vst [vmem:[%s1554_s15 + $0x28] sm:$0xff] %v482_v44 }
 0x110   : > { %v505_v46 = vpop.f32.mrf.mxu2  ;;  %636 = vst [vmem:[%s1558_s22 + $0x28] sm:$0xff] %v599_v45 }
 0x111   : > { %v622_v47 = vpop.f32.mrf.mxu3  ;;  %v506_v48 = vadd.f32 %v1544_v0, %v505_v46 }
 0x112   : > { %v623_v49 = vadd.f32 %v1549_v1, %v622_v47 }
 0x113   : > { %527 = vst [vmem:[%s1554_s15 + $0x68] sm:$0xff] %v506_v48 }
 0x114   : > { %644 = vst [vmem:[%s1558_s22 + $0x68] sm:$0xff] %v623_v49  ;;  %v484_v50 = vpop.f32.mrf.mxu0  ;;  %v601_v51 = vpop.f32.mrf.mxu1 }
 0x115   : > { %v485_v52 = vadd.f32 %v1544_v0, %v484_v50  ;;  %v602_v53 = vadd.f32 %v1549_v1, %v601_v51 }
 0x117   : > { %520 = vst [vmem:[%s1554_s15 + $0x30] sm:$0xff] %v485_v52 }
 0x118   : > { %v508_v54 = vpop.f32.mrf.mxu2  ;;  %637 = vst [vmem:[%s1558_s22 + $0x30] sm:$0xff] %v602_v53 }
 0x119   : > { %v625_v55 = vpop.f32.mrf.mxu3  ;;  %v509_v56 = vadd.f32 %v1544_v0, %v508_v54 }
 0x11a   : > { %v626_v57 = vadd.f32 %v1549_v1, %v625_v55 }
 0x11b   : > { %528 = vst [vmem:[%s1554_s15 + $0x70] sm:$0xff] %v509_v56 }
 0x11c   : > { %645 = vst [vmem:[%s1558_s22 + $0x70] sm:$0xff] %v626_v57  ;;  %v487_v58 = vpop.f32.mrf.mxu0  ;;  %v604_v59 = vpop.f32.mrf.mxu1 }
 0x11d   : > { %v488_v60 = vadd.f32 %v1544_v0, %v487_v58  ;;  %v605_v61 = vadd.f32 %v1549_v1, %v604_v59 }
 0x11f   : > { %521 = vst [vmem:[%s1554_s15 + $0x38] sm:$0xff] %v488_v60 }
 0x120   : > { %v511_v62 = vpop.f32.mrf.mxu2  ;;  %638 = vst [vmem:[%s1558_s22 + $0x38] sm:$0xff] %v605_v61 }
 0x121   : > { %v628_v63 = vpop.f32.mrf.mxu3  ;;  %v512_v2 = vadd.f32 %v1544_v0, %v511_v62 }
 0x122   : > { %v629_v3 = vadd.f32 %v1549_v1, %v628_v63 }
 0x123   : > { %529 = vst [vmem:[%s1554_s15 + $0x78] sm:$0xff] %v512_v2 }
 0x124   : > { %646 = vst [vmem:[%s1558_s22 + $0x78] sm:$0xff] %v629_v3 }
 0x125   : > { %1185 = shalt.err (!%p1182_p13)
}
 0x126   : > { %s1306_s15 = smov 128   ;;  %s1307_s22 = smov 8  }
 0x127   : > { %935 = dma.vmem_to_hbm [thread:$0]  (%p1445_p5), %s1625_s12, 2048, %s670_s9, %s648_s13, %s1306_s15, %s1306_s15, %s1307_s22  }
 0x128   : > { %s653_s17 = scalar_lea.sflag [#allocation12], %s1480_s28  ;;  %s1200_s18 = sshra.s32 %s1634_s10, 4  ;;  %s1201_s18 = int_to_ptr.hbm [resolvable:$true] %s1200_s18 }
 0x129   : > { %s1202_s30 = scalar_lea.hbm %s1201_s18, 128  ;;  %s1206_s23 = scalar_lea.hbm %s1735_s16, 512 }
 0x12a   : > { %p1203_p0 = scmp.ne.s32.totalorder %s1201_s18, %s1202_s30  ;;  %p1207_p9 = scmp.lt.s32.totalorder %s1201_s18, %s1735_s16 }
 0x12b   : > { %p1208_p2 = scmp.lt.s32.totalorder %s1206_s23, %s1202_s30 }
 0x12c   : > { %p1204_p3 = pnand %p1203_p0, %p1445_p5 }
 0x12d   : > { %p1209_p1 = por %p1208_p2, %p1207_p9 }
 0x12e   : > { %p1205_p7 = pneg %p1204_p3 }
 0x130   : > { %p1210_p4 = pnand %p1209_p1, %p1205_p7 }
 0x132   : > { %1213 = shalt.err (!%p1210_p4)
}
 0x133   : > { %936 = dma.vmem_to_hbm [thread:$0]  (%p1445_p5), %s1632_s21, 2048, %s1634_s10, %s653_s17, %s1306_s15, %s1306_s15, %s1307_s22  }
 0x134 PF: > { %s1737_s28 = sld [smem:[#allocation19_spill]]  ;;  %p965_p8 = scmp.ge.s32.totalorder %s1300_s8, 2 }
 0x136   : > { %p954_p10 = pnand %p965_p8, %p1403_p6 }
 0x138   : > { %p955_p11 = pneg %p954_p10 }
 0x13a   : > { %s703_s9 = sand.u32 1, %s1737_s28  }
 0x13b   : > { %s704_s13 = scalar_lea.sflag [#allocation4], %s703_s9 }
 0x13c   : > { %1263 = dma.done.wait (%p955_p11), %s704_s13, 2048  }
 0x13d   : > { %1265 = vsyncadd (%p955_p11), %s704_s13, 4294965248  ;;  %s714_s27 = scalar_lea.sflag [#allocation12], %s703_s9 }
 0x13e   : > { %1267 = dma.done.wait (%p955_p11), %s714_s27, 2048  }
 0x13f   : > { %1269 = vsyncadd (%p955_p11), %s714_s27, 4294965248  ;;  %s31_s8 = sadd.s32 1, %s1300_s8   ;;  %s1739_s11 = smov %s1458_s24 }
 0x140   : > { %p28_p12 = scmp.ge.s32.totalorder %s31_s8, 6   ;;  %s1740_s28 = sld [smem:[#allocation21_spill]] }
 0x141   : > { %s1741_s21 = sld [smem:[#allocation23_spill]]  ;;  %s1743_s24 = smov %s1276_s25 }
 0x142   : > { %s1742_s30 = sld [smem:[#allocation25_spill]]  ;;  %s1744_s25 = smov %s1280_s26 }
 0x143   : > { %s1745_s26 = smov %s1739_s11  ;;  %s1746_s27 = smov %s1292_s29 }
 0x144   :  { %30 = sbr.rel (!%p28_p12) target bundleno = 17 (0x11), region = 127 }
 0x147   : > { %s1747_s29 = smov %s1741_s21 }
 0x149   :  { %720 = vsyncpa [#allocation3], 1 }
 0x14a   :  { %722 = vsyncpa [#allocation3 + $0x1], 1 }
 0x14b   :  { %723 = vsyncpa [#allocation6], 1 }
 0x14c   :  { %725 = vsyncpa [#allocation6 + $0x1], 1 }
 0x14d   :  { %726 = vsyncpa [#allocation9], 1 }
 0x14e   :  { %727 = vsyncpa [#allocation4], 1 }
 0x14f   :  { %729 = vsyncpa [#allocation4 + $0x1], 1 }
 0x150   :  { %730 = vsyncpa [#allocation12], 1 }
 0x151   :  { %732 = vsyncpa [#allocation12 + $0x1], 1 }

</bundles_post_ra>
